<compile_context>
chip_gen: v6e
topology: v6e:2x2x1
jax: 0.10.0
libtpu: 0.0.40
codegen_flags: <defaults>
</compile_context>

<pallas_src>
import functools

import jax
import jax.numpy as jnp
from jax import lax
from jax.experimental import pallas as pl
from jax.experimental.pallas import tpu as pltpu


# ---------------------------------------------------------------------------
# Kernels
# ---------------------------------------------------------------------------

def _se_fused_kernel(x_ref, w1_ref, w2_ref, o_ref, *, inv_hw):
    """Single pass: one (TB, C, HW) slab per grid step (grid over batch blocks)."""
    # Squeeze: mean over the spatial (lane) axis, accumulated in f32.
    y = jnp.sum(x_ref[...].astype(jnp.float32), axis=-1) * inv_hw      # (TB, C)
    # Excitation (weights pre-transposed to K-major, hidden zero-padded).
    h = jnp.dot(y, w1_ref[...], preferred_element_type=jnp.float32)    # (TB, Hp)
    h = jnp.maximum(h, 0.0)
    s = jnp.dot(h, w2_ref[...], preferred_element_type=jnp.float32)    # (TB, C)
    s = jax.nn.sigmoid(s)
    # Scale: re-read x (cheap VMEM loads), multiply in f32, cast once on store.
    o_ref[...] = (x_ref[...].astype(jnp.float32) * s[:, :, None]).astype(o_ref.dtype)


def _se_pool_excite_kernel(x_ref, w1_ref, w2_ref, s_ref, acc_ref,
                           *, inv_hw, hw, hw_tile):
    """Sweep 1 (large maps): accumulate pooled sum over HW tiles, then excite."""
    t = pl.program_id(1)

    @pl.when(t == 0)
    def _():
        acc_ref[...] = jnp.zeros_like(acc_ref)

    x = x_ref[...].astype(jnp.float32)                        # (1, C, hw_tile)
    if hw % hw_tile != 0:  # static: last HW tile is ragged -> mask OOB lanes
        lane = lax.broadcasted_iota(jnp.int32, x.shape, 2)
        x = jnp.where(lane < (hw - t * hw_tile), x, 0.0)
    acc_ref[...] += jnp.sum(x, axis=-1)                       # (1, C)

    @pl.when(t == pl.num_programs(1) - 1)
    def _():
        y = acc_ref[...] * inv_hw                             # (1, C)
        h = jnp.maximum(jnp.dot(y, w1_ref[...],
                                preferred_element_type=jnp.float32), 0.0)
        s = jax.nn.sigmoid(jnp.dot(h, w2_ref[...],
                                   preferred_element_type=jnp.float32))
        s_ref[...] = s[:, :, None]                            # (1, C, 1) f32


def _se_scale_kernel(x_ref, s_ref, o_ref):
    """Sweep 2 (large maps): o = x * gate, tile by tile (HBM-bandwidth bound)."""
    o_ref[...] = (x_ref[...].astype(jnp.float32) * s_ref[...]).astype(o_ref.dtype)


# ---------------------------------------------------------------------------
# Wrapper
# ---------------------------------------------------------------------------

def _chip_budget():
    """Per-generation (max_block_bytes, physical_vmem_bytes)."""
    try:
        cap = int(pltpu.get_tpu_info().vmem_capacity_bytes)
    except Exception:
        cap = None
    if cap is None or cap <= 0:
        cap = 64 << 20                       # conservative default (v7x-sized)
    if cap >= (100 << 20):                   # v5e / v6e: 128 MiB VMEM per core
        return 14 << 20, cap
    return 6 << 20, cap                      # v7x: 64 MiB VMEM per core


def _vmem_limit(block_bytes, block_f32_bytes, w_bytes, cap_bytes):
    # in+out double-buffered + one f32 temp of the block + weights + slack.
    need = 4 * block_bytes + block_f32_bytes + 2 * w_bytes + (4 << 20)
    return int(max(16 << 20, min(need, cap_bytes - (16 << 20))))


def se_block(x_nchw, fc1_w, fc2_w, *, max_block_bytes=None):
    """SEBlock forward.

    x_nchw: (B, C, H, W); fc1_w: (C//r, C); fc2_w: (C, C//r) (torch layout).
    """
    B, C, H, W = x_nchw.shape
    HW = H * W
    dtype = x_nchw.dtype
    itemsize = jnp.dtype(dtype).itemsize
    hidden = fc1_w.shape[0]
    inv_hw = 1.0 / float(HW)

    auto_block, vmem_cap = _chip_budget()
    if max_block_bytes is None:
        max_block_bytes = auto_block

    # Pre-transpose weights once to K-major and zero-pad hidden to a lane-dense
    # multiple of 128 (exact: padded columns/rows contribute zero).
    Hp = pl.cdiv(max(hidden, 1), 128) * 128
    w1 = fc1_w.astype(jnp.float32).T                 # (C, hidden)
    w2 = fc2_w.astype(jnp.float32).T                 # (hidden, C)
    if Hp != hidden:
        w1 = jnp.pad(w1, ((0, 0), (0, Hp - hidden)))
        w2 = jnp.pad(w2, ((0, Hp - hidden), (0, 0)))
    w_bytes = (w1.size + w2.size) * 4

    x_flat = x_nchw.reshape(B, C, HW)
    row_bytes = C * HW * itemsize

    if row_bytes <= max_block_bytes:
        # ------------ single pass: grid over blocks of batch rows ------------
        tb = max(1, min(B, max_block_bytes // row_bytes))
        if B >= 2:
            tb = max(1, min(tb, B // 2))     # keep >= 2 grid steps (v7x: 2 TCs)
        while B % tb:                        # make tb a divisor of B
            tb -= 1
        block_bytes = tb * row_bytes
        vmem_limit = _vmem_limit(block_bytes, tb * C * HW * 4, w_bytes, vmem_cap)

        out_flat = pl.pallas_call(
            functools.partial(_se_fused_kernel, inv_hw=inv_hw),
            out_shape=jax.ShapeDtypeStruct((B, C, HW), dtype),
            grid_spec=pltpu.PrefetchScalarGridSpec(
                num_scalar_prefetch=0,
                grid=(B // tb,),
                in_specs=[
                    pl.BlockSpec((tb, C, HW), lambda b: (b, 0, 0)),
                    pl.BlockSpec(w1.shape, lambda b: (0, 0)),
                    pl.BlockSpec(w2.shape, lambda b: (0, 0)),
                ],
                out_specs=pl.BlockSpec((tb, C, HW), lambda b: (b, 0, 0)),
            ),
            compiler_params=pltpu.CompilerParams(
                dimension_semantics=("parallel",),
                vmem_limit_bytes=vmem_limit),
            cost_estimate=pl.CostEstimate(
                flops=2 * B * C * HW + 4 * B * C * Hp,
                transcendentals=B * C,
                bytes_accessed=2 * B * C * HW * itemsize + w_bytes),
        )(x_flat, w1, w2)
    else:
        # ----- two sweeps: pool+excite over HW tiles, then scale (big maps) -----
        hw_cap = pl.cdiv(HW, 128) * 128
        hw_tile = max(128, min(hw_cap,
                               (max_block_bytes // (C * itemsize)) // 128 * 128))
        # Keep the lane dim wide for streaming efficiency when it stays cheap.
        if hw_tile < 512 <= hw_cap and C * 512 * itemsize <= 2 * max_block_bytes:
            hw_tile = 512
        # TODO(synk): for very large C also tile the channel axis so hw_tile can
        # stay >= 512 without blowing the per-step VMEM budget.
        n_hw = pl.cdiv(HW, hw_tile)
        block_bytes = C * hw_tile * itemsize
        vmem_limit = _vmem_limit(block_bytes, C * hw_tile * 4, w_bytes, vmem_cap)

        gates = pl.pallas_call(
            functools.partial(_se_pool_excite_kernel, inv_hw=inv_hw,
                              hw=HW, hw_tile=hw_tile),
            out_shape=jax.ShapeDtypeStruct((B, C, 1), jnp.float32),
            grid_spec=pltpu.PrefetchScalarGridSpec(
                num_scalar_prefetch=0,
                grid=(B, n_hw),
                in_specs=[
                    pl.BlockSpec((1, C, hw_tile), lambda b, t: (b, 0, t)),
                    pl.BlockSpec(w1.shape, lambda b, t: (0, 0)),
                    pl.BlockSpec(w2.shape, lambda b, t: (0, 0)),
                ],
                out_specs=pl.BlockSpec((1, C, 1), lambda b, t: (b, 0, 0)),
                scratch_shapes=[pltpu.VMEM((1, C), jnp.float32)],
            ),
            compiler_params=pltpu.CompilerParams(
                dimension_semantics=("parallel", "arbitrary"),
                vmem_limit_bytes=vmem_limit),
            cost_estimate=pl.CostEstimate(
                flops=B * C * HW + 4 * B * C * Hp,
                transcendentals=B * C,
                bytes_accessed=B * C * HW * itemsize + w_bytes + B * C * 4),
        )(x_flat, w1, w2)

        out_flat = pl.pallas_call(
            _se_scale_kernel,
            out_shape=jax.ShapeDtypeStruct((B, C, HW), dtype),
            grid_spec=pltpu.PrefetchScalarGridSpec(
                num_scalar_prefetch=0,
                grid=(B, n_hw),
                in_specs=[
                    pl.BlockSpec((1, C, hw_tile), lambda b, t: (b, 0, t)),
                    pl.BlockSpec((1, C, 1), lambda b, t: (b, 0, 0)),
                ],
                out_specs=pl.BlockSpec((1, C, hw_tile), lambda b, t: (b, 0, t)),
            ),
            compiler_params=pltpu.CompilerParams(
                dimension_semantics=("parallel", "parallel"),
                vmem_limit_bytes=vmem_limit),
            cost_estimate=pl.CostEstimate(
                flops=B * C * HW,
                transcendentals=0,
                bytes_accessed=2 * B * C * HW * itemsize + B * C * 4),
        )(x_flat, gates)

    return out_flat.reshape(B, C, H, W)


def se_block_ref(x_nchw, fc1_w, fc2_w):
    """Pure-JAX reference matching the PyTorch forward."""
    y = jnp.mean(x_nchw, axis=(2, 3))                 # AdaptiveAvgPool2d(1) + view
    y = jnp.maximum(y @ fc1_w.T, 0.0)                 # Linear + ReLU
    y = jax.nn.sigmoid(y @ fc2_w.T)                   # Linear + Sigmoid
    return x_nchw * y[:, :, None, None]


if __name__ == "__main__":
    # SEBlock(num_channels=64, reduction_ratio=16) -> hidden = 4
    B, C = 2, 64
    reduction_ratio = 16
    hidden = C // reduction_ratio

    key = jax.random.PRNGKey(0)
    kx, k1, k2, kx2, kx3 = jax.random.split(key, 5)

    # torch nn.Linear layout: (out, in), bias=False.
    fc1_w = jax.random.normal(k1, (hidden, C), dtype=jnp.float32) * 0.1
    fc2_w = jax.random.normal(k2, (C, hidden), dtype=jnp.float32) * 0.1

    # 1) Standard shapes (fused path, HW = 256, two batch rows -> grid of 2).
    x = jax.random.normal(kx, (B, C, 16, 16), dtype=jnp.float32)
    ref = se_block_ref(x, fc1_w, fc2_w)
    out = jax.block_until_ready(se_block(x, fc1_w, fc2_w))
    assert out.shape == (B, C, 16, 16)
    assert jnp.allclose(out, ref, atol=1e-5, rtol=1e-5), "fused path mismatch"

    # 2) Non-128-multiple spatial size (fused path uses a full-extent last dim;
    #    no wrapper padding / slicing involved).
    x2 = jax.random.normal(kx2, (B, C, 10, 10), dtype=jnp.float32)
    ref2 = se_block_ref(x2, fc1_w, fc2_w)
    out2 = jax.block_until_ready(se_block(x2, fc1_w, fc2_w))
    assert jnp.allclose(out2, ref2, atol=1e-5, rtol=1e-5), "fused ragged mismatch"

    # 3) Force the two-sweep tiled path with a ragged last HW tile
    #    (HW = 400, hw_tile = 128 -> last tile has 16 valid lanes).
    x3 = jax.random.normal(kx3, (B, C, 20, 20), dtype=jnp.float32)
    ref3 = se_block_ref(x3, fc1_w, fc2_w)
    out3 = jax.block_until_ready(
        se_block(x3, fc1_w, fc2_w, max_block_bytes=32 * 1024))
    assert jnp.allclose(out3, ref3, atol=1e-5, rtol=1e-5), "tiled path mismatch"

    print("KERNEL_OK")
</pallas_src>

<mosaic_0001>
module attributes {stable_mosaic.version = 11 : i64} {
  func.func @_se_fused_kernel(%arg0: i32, %arg1: memref<1x64x256xf32, #tpu.memory_space<vmem>>, %arg2: memref<64x128xf32, #tpu.memory_space<vmem>>, %arg3: memref<128x64xf32, #tpu.memory_space<vmem>>, %arg4: memref<1x64x256xf32, #tpu.memory_space<vmem>>) attributes {dimension_semantics = [#tpu.dimension_semantics<parallel>], iteration_bounds = array<i64: 2>, scalar_prefetch = 0 : i64, scratch_operands = 0 : i64, tpu.core_type = #tpu.core_type<tc>, window_params = [{transform_indices = @transform_0, window_bounds = array<i64: 1, 64, 256>}, {pipeline_mode = #tpu.pipeline_mode<synchronous>, transform_indices = @transform_1, window_bounds = array<i64: 64, 128>}, {pipeline_mode = #tpu.pipeline_mode<synchronous>, transform_indices = @transform_2, window_bounds = array<i64: 128, 64>}, {transform_indices = @transform_3, window_bounds = array<i64: 1, 64, 256>}]} {
    %c0 = arith.constant 0 : index
    %c0_0 = arith.constant 0 : index
    %c0_1 = arith.constant 0 : index
    %0 = vector.load %arg1[%c0, %c0_0, %c0_1] : memref<1x64x256xf32, #tpu.memory_space<vmem>>, vector<1x64x256xf32>
    %cst = arith.constant dense<0.000000e+00> : vector<1x64xf32>
    %1 = vector.multi_reduction <add>, %0, %cst [2] : vector<1x64x256xf32> to vector<1x64xf32>
    %cst_2 = arith.constant 3.906250e-03 : f32
    %2 = vector.broadcast %cst_2 : f32 to vector<1x64xf32>
    %3 = arith.mulf %1, %2 : vector<1x64xf32>
    %c0_3 = arith.constant 0 : index
    %c0_4 = arith.constant 0 : index
    %4 = vector.load %arg2[%c0_3, %c0_4] : memref<64x128xf32, #tpu.memory_space<vmem>>, vector<64x128xf32>
    %cst_5 = arith.constant dense<0.000000e+00> : vector<1x128xf32>
    %5 = tpu.matmul %3, %4, %cst_5 {dimension_numbers = #tpu.dot_dimension_numbers<[1], [0], [0], [1], [0, 0, 1, 1], [], []>} : vector<1x64xf32>, vector<64x128xf32>, vector<1x128xf32> -> vector<1x128xf32>
    %cst_6 = arith.constant 0.000000e+00 : f32
    %6 = vector.broadcast %cst_6 : f32 to vector<1x128xf32>
    %7 = arith.maximumf %5, %6 : vector<1x128xf32>
    %c0_7 = arith.constant 0 : index
    %c0_8 = arith.constant 0 : index
    %8 = vector.load %arg3[%c0_7, %c0_8] : memref<128x64xf32, #tpu.memory_space<vmem>>, vector<128x64xf32>
    %cst_9 = arith.constant dense<0.000000e+00> : vector<1x64xf32>
    %9 = tpu.matmul %7, %8, %cst_9 {dimension_numbers = #tpu.dot_dimension_numbers<[1], [0], [0], [1], [0, 0, 1, 1], [], []>} : vector<1x128xf32>, vector<128x64xf32>, vector<1x64xf32> -> vector<1x64xf32>
    %10 = arith.negf %9 : vector<1x64xf32>
    %11 = math.exp %10 : vector<1x64xf32>
    %cst_10 = arith.constant 1.000000e+00 : f32
    %12 = vector.broadcast %cst_10 : f32 to vector<1x64xf32>
    %13 = arith.addf %12, %11 : vector<1x64xf32>
    %14 = arith.divf %12, %13 : vector<1x64xf32>
    %c0_11 = arith.constant 0 : index
    %c0_12 = arith.constant 0 : index
    %c0_13 = arith.constant 0 : index
    %15 = vector.load %arg1[%c0_11, %c0_12, %c0_13] : memref<1x64x256xf32, #tpu.memory_space<vmem>>, vector<1x64x256xf32>
    %16 = vector.shape_cast %14 : vector<1x64xf32> to vector<1x64x1xf32>
    %17 = vector.broadcast %16 : vector<1x64x1xf32> to vector<1x64x256xf32>
    %18 = arith.mulf %15, %17 : vector<1x64x256xf32>
    %c0_14 = arith.constant 0 : index
    %c0_15 = arith.constant 0 : index
    %c0_16 = arith.constant 0 : index
    %19 = vector.load %arg4[%c0_14, %c0_15, %c0_16] : memref<1x64x256xf32, #tpu.memory_space<vmem>>, vector<1x64x256xf32>
    tpu.vector_store %arg4[%c0_14, %c0_15, %c0_16], %18 {strides = array<i32>} : memref<1x64x256xf32, #tpu.memory_space<vmem>>, vector<1x64x256xf32>,
    return
  }
  func.func @transform_0(%arg0: i32) -> (i32, i32, i32) {
    %c0_i32 = arith.constant 0 : i32
    %c0_i32_0 = arith.constant 0 : i32
    %c0_i32_1 = arith.constant 0 : i32
    return %arg0, %c0_i32, %c0_i32_0 : i32, i32, i32
  }
  func.func @transform_1(%arg0: i32) -> (i32, i32) {
    %c0_i32 = arith.constant 0 : i32
    %c0_i32_0 = arith.constant 0 : i32
    %c0_i32_1 = arith.constant 0 : i32
    return %c0_i32, %c0_i32_0 : i32, i32
  }
  func.func @transform_2(%arg0: i32) -> (i32, i32) {
    %c0_i32 = arith.constant 0 : i32
    %c0_i32_0 = arith.constant 0 : i32
    %c0_i32_1 = arith.constant 0 : i32
    return %c0_i32, %c0_i32_0 : i32, i32
  }
  func.func @transform_3(%arg0: i32) -> (i32, i32, i32) {
    %c0_i32 = arith.constant 0 : i32
    %c0_i32_0 = arith.constant 0 : i32
    %c0_i32_1 = arith.constant 0 : i32
    return %arg0, %c0_i32, %c0_i32_0 : i32, i32, i32
  }
}

</mosaic_0001>

<bundles_post_ra>
// kernel: tpu_custom_call.1
= control target key start
LH: loop header
LB: loop body
LE: loop exit
PB: predicated region body
PF: predicated region fallthrough
CT: control target
= control target key end

     0   :  { %8 = vsyncpa [#allocation3], 0  ;;  %s1255_s0 = inlined_call_operand.hbm [shape: f32[2,64,256], index: 0, kind: input, shape index: {}]   ;;  %s1256_s1 = inlined_call_operand.vmem [shape: f32[64,128], index: 1, kind: input, shape index: {}]   ;;  %s1257_s2 = inlined_call_operand.vmem [shape: f32[128,64], index: 2, kind: input, shape index: {}]   ;;  %s1258_s3 = inlined_call_operand.hbm [shape: f32[2,64,256], index: 3, kind: output, shape index: {}]  }
   0x1   :  { %10 = vsyncpa [#allocation3 + $0x1], 0 }
   0x2   :  { %11 = vsyncpa [#allocation4], 0 }
   0x3   :  { %13 = vsyncpa [#allocation4 + $0x1], 0  ;;  %s904_s12 = smov 0   ;;  %s906_s13 = smov 0  }
   0x4   :  { %s908_s14 = smov 0   ;;  %s910_s15 = smov 0  }
   0x5 LB: > { %s925_s16 = sadd.s32 4294967295, %s874_s15   ;;  %s628_s17 = sadd.s32 4294967294, %s874_s15   ;;  %s874_s15 = sphi %s910_s15, %s1273_s15   ;;  %s870_s14 = sphi %s908_s14, %s1272_s14   ;;  %s866_s13 = sphi %s906_s13, %s1271_s13   ;;  %s862_s12 = sphi %s904_s12, %s1270_s12  }
   0x6   : > { %s929_s18 = sadd.s32 1, %s874_s15   ;;  %s26_s19 = sadd.s32 1, %s870_s14 }
   0x7   : > { %s23_s20 = ssub.s32 %s874_s15, %s929_s18  ;;  %p33_p0 = scmp.ne.s32.totalorder %s870_s14, %s866_s13 }
   0x8   : > { %p24_p1 = scmp.eq.s32.totalorder %s23_s20, 0  ;;  %p34_p2 = scmp.eq.s32.totalorder %s874_s15, 0 }
   0x9   : > { %p39_p3 = scmp.ne.s32.totalorder %s866_s13, %s862_s12  ;;  %p40_p4 = scmp.eq.s32.totalorder %s925_s16, 0 }
   0xa   : > { %s941_s21 = scalar_select %p24_p1, %s870_s14, %s26_s19  }
   0xb   : > { %p943_p5 = por %p34_p2, %p33_p0  ;;  %p947_p6 = por %p40_p4, %p39_p3 }
   0xc   : > { %p105_p7 = scmp.eq.s32.totalorder %s925_s16, 1  ;;  %p111_p8 = scmp.eq.s32.totalorder %s628_s17, 1 }
   0xd   : > { %s1262_s23 = scalar_select %p947_p6, 1, 0 }
   0xe   : > { %p738_p10 = scmp.lt.s32.totalorder %s874_s15, 2  ;;  %p954_p11 = por %p105_p7, %p33_p0 }
   0xf   : > { %p958_p12 = por %p111_p8, %p39_p3  ;;  %s137_s26 = sand.u32 1, %s870_s14  }
  0x10   : > { %s1263_s24 = scalar_select %p954_p11, 1, 0 }
  0x11   : > { %s1264_s25 = scalar_select %p958_p12, 1, 0 }
  0x12   : > { %s644_s27 = sshll.u32 %s874_s15, 11  ;;  %s631_s28 = sshll.u32 %s137_s26, 7 }
  0x13   : > { %s967_s4 = scalar_lea.hbm %s1255_s0, %s644_s27  ;;  %s141_s5 = scalar_lea.vmem [#allocation2], %s631_s28 }
  0x14   : > { %s148_s6 = sshll.u32 %s141_s5, 4  ;;  %p971_p13 = pnand %p738_p10, %p943_p5  ;;  %s975_s6 = int_to_ptr.vmem [resolvable:$true] %s148_s6 }
  0x15   : > { %s977_s8 = scalar_lea.sflag [#allocation3], %s137_s26  ;;  %s782_s9 = scalar_lea.hbm %s967_s4, 2048 }
  0x16   : > { %p783_p0 = scmp.ne.s32.totalorder %s967_s4, %s782_s9  ;;  %p784_p1 = pneg %p971_p13 }
  0x17   : > { %s787_s17 = scalar_lea.hbm %s1255_s0, 4096  ;;  %p788_p4 = scmp.lt.s32.totalorder %s967_s4, %s1255_s0 }
  0x18   : > { %p785_p2 = pnand %p784_p1, %p783_p0  ;;  %p789_p5 = scmp.lt.s32.totalorder %s787_s17, %s782_s9 }
  0x1a   : > { %p786_p3 = pneg %p785_p2  ;;  %p790_p7 = por %p789_p5, %p788_p4 }
  0x1c   : > { %p791_p8 = pnand %p790_p7, %p786_p3 }
  0x1e   : > { %794 = shalt.err (!%p791_p8)
}
  0x1f   : > { %s795_s22 = scalar_lea.vmem %s975_s6, 2048  ;;  %s876_s26 = smov [#allocation2]  }
  0x20   : > { %p796_p10 = scmp.ne.s32.totalorder %s975_s6, %s795_s22  ;;  %s800_s27 = sshll.u32 %s876_s26, 4  ;;  %s801_s27 = int_to_ptr.vmem [resolvable:$false] %s800_s27 }
  0x21   : > { %s802_s28 = scalar_lea.vmem %s801_s27, 4096  ;;  %p803_p2 = scmp.lt.s32.totalorder %s975_s6, %s801_s27 }
  0x22   : > { %p798_p9 = pnand %p796_p10, %p784_p1  ;;  %p804_p12 = scmp.lt.s32.totalorder %s802_s28, %s795_s22 }
  0x24   : > { %p799_p0 = pneg %p798_p9  ;;  %p805_p11 = por %p804_p12, %p803_p2 }
  0x26   : > { %p806_p6 = pnand %p805_p11, %p799_p0 }
  0x28   : > { %809 = shalt.err (!%p806_p6)
}
  0x29   : > { %s877_s29 = smov 256   ;;  %s878_s30 = smov 16  }
  0x2a   : > { %733 = dma.hbm_to_vmem [thread:$0]  (!%p971_p13), %s967_s4, 2048, %s975_s6, %s977_s8, %s877_s29, %s877_s29, %s878_s30  }
  0x2b   : > { %p634_p9 = scmp.ge.s32.totalorder %s874_s15, 1  ;;  %p156_p1 = scmp.lt.s32.totalorder %s874_s15, 3 }
  0x2d   : > { %p157_p3 = pnand %p634_p9, %p156_p1 }
  0x2e   : > { %s1001_s5 = sand.u32 (!%p157_p3), 1, %s866_s13   ;;  %p1266_p6 = scmp.ne.s32.totalorder (!%p157_p3), %s1262_s23, 0 }
  0x2f   : > { %160 = sbr.rel (%p157_p3) target bundleno = 781 (0x30d), region = 32  ;;  %s635_s9 = sshll.u32 (!%p157_p3), %s1001_s5, 7 }
  0x30   : > { %s163_s10 = scalar_lea.sflag (!%p157_p3), [#allocation3], %s1001_s5  ;;  %s166_s11 = scalar_lea.vmem (!%p157_p3), [#allocation2], %s635_s9 }
  0x34   : > { %853 = dma.done.wait (%p1266_p6), %s163_s10, 2048  }
  0x35   : > { %855 = vsyncadd (%p1266_p6), %s163_s10, 4294965248  ;;  %v1011_v0 = vld [vmem:[%s166_s11] sm:$0xff]  ;;  %v1013_v1 = vld [vmem:[%s166_s11 + $0x8] sm:$0xff]  ;;  %v879_v24 = vmov 0.0   ;;  %vm880_vm0 = vmmov 0   ;;  %v253_v47 = vlaneseq  ;;  %vm264_vm1 = vcmask 130112  }
  0x36   : > { %v1015_v2 = vld [vmem:[%s166_s11 + $0x20] sm:$0xff]  ;;  %v205_v3 = vadd.f32 %v1013_v1, %v1011_v0  ;;  %v1019_v4 = vld [vmem:[%s166_s11 + $0x28] sm:$0xff]  ;;  %v1021_v5 = vld [vmem:[%s166_s11 + $0x10] sm:$0xff]  ;;  %672 = vmatprep.subr.mxu0 %v879_v24  ;;  %691 = vmatprep.subr.mxu1 %v879_v24  ;;  %vm271_vm2 = vcmask 195712   ;;  %vm278_vm3 = vcmask 261312   ;;  %vm285_vm4 = vcmask 326912  }
  0x37   : > { %v1023_v6 = vld [vmem:[%s166_s11 + $0x18] sm:$0xff]  ;;  %v211_v7 = vadd.f32 %v1019_v4, %v1015_v2  ;;  %v1027_v8 = vld [vmem:[%s166_s11 + $0x30] sm:$0xff]  ;;  %v1035_v12 = vld [vmem:[%s166_s11 + $0x40] sm:$0xff]  ;;  %688 = vmatprep.mubr.msk.f32.mxu0 %vm880_vm0, %v879_v24  ;;  %723 = vmatprep.mubr.msk.f32.mxu1 %vm880_vm0, %v879_v24  ;;  %v254_v48 = vand.u32 127, %v253_v47  ;;  %v1150_v49 = vshrl.u32 %v253_v47, 7  ;;  %vm292_vm5 = vcmask 392512  }
  0x38   : > { %v1029_v9 = vld [vmem:[%s166_s11 + $0x38] sm:$0xff]  ;;  %206 = vadd.xlane.f32.xlu0 %v205_v3  ;;  %v208_v10 = vadd.f32 %v1023_v6, %v1021_v5  ;;  %v1037_v13 = vld [vmem:[%s166_s11 + $0x48] sm:$0xff]  ;;  %v1039_v14 = vld [vmem:[%s166_s11 + $0x50] sm:$0xff]  ;;  %vm299_vm6 = vcmask 458112   ;;  %vm306_vm7 = vcmask 523712   ;;  %vm308_vm8 = vcmask 523264  }
  0x39   : > { %212 = vadd.xlane.f32.xlu1 %v211_v7  ;;  %v214_v11 = vadd.f32 %v1029_v9, %v1027_v8  ;;  %v1041_v15 = vld [vmem:[%s166_s11 + $0x58] sm:$0xff]  ;;  %v217_v16 = vadd.f32 %v1037_v13, %v1035_v12  ;;  %v1047_v18 = vld [vmem:[%s166_s11 + $0x60] sm:$0xff]  ;;  %v1049_v19 = vld [vmem:[%s166_s11 + $0x68] sm:$0xff]  ;;  %v259_v50 = vadd.s32 4294967288, %v254_v48  ;;  %v266_v52 = vadd.s32 4294967280, %v254_v48  ;;  %s1175_s23 = scalar_lea.vmem [#allocation5], %s635_s9 }
  0x3a   : > { %v220_v17 = vadd.f32 %v1041_v15, %v1039_v14  ;;  %v1051_v20 = vld [vmem:[%s166_s11 + $0x70] sm:$0xff]  ;;  %v1053_v21 = vld [vmem:[%s166_s11 + $0x78] sm:$0xff]  ;;  %v223_v22 = vadd.f32 %v1049_v19, %v1047_v18  ;;  %v242_v27 = vld [vmem:[%s1256_s1 + $0x28] sm:$0xff]  ;;  %v273_v53 = vadd.s32 4294967272, %v254_v48  ;;  %v257_v55 = vsub.s32 %v254_v48, %v1150_v49  ;;  %s645_s9 = sshll.u32 %s925_s16, 11  ;;  %s555_s4 = sshll.u32 %s1175_s23, 4  ;;  %s1208_s4 = int_to_ptr.vmem [resolvable:$true] %s555_s4 }
  0x3b   : > { %v226_v23 = vadd.f32 %v1053_v21, %v1051_v20  ;;  %v244_v25 = vld [vmem:[%s1256_s1 + $0x38] sm:$0xff]  ;;  %v243_v26 = vld [vmem:[%s1256_s1 + $0x30] sm:$0xff]  ;;  %v241_v28 = vld [vmem:[%s1256_s1 + $0x20] sm:$0xff]  ;;  %v262_v57 = vsub.s32 %v259_v50, %v1150_v49  ;;  %v280_v58 = vadd.s32 4294967264, %v254_v48  ;;  %v269_v59 = vsub.s32 %v266_v52, %v1150_v49  ;;  %s1206_s8 = scalar_lea.hbm %s1258_s3, %s645_s9  ;;  %s542_s16 = scalar_lea.sflag [#allocation4], %s1001_s5 }
  0x3c   : > { %209 = vadd.xlane.f32.xlu0 %v208_v10  ;;  %673 = vmatpush3.msra.mxu0 %v244_v25  ;;  %v240_v29 = vld [vmem:[%s1256_s1 + $0x18] sm:$0xff]  ;;  %v239_v30 = vld [vmem:[%s1256_s1 + $0x10] sm:$0xff]  ;;  %v238_v31 = vld [vmem:[%s1256_s1 + $0x8] sm:$0xff]  ;;  %v276_v62 = vsub.s32 %v273_v53, %v1150_v49  ;;  %v287_v63 = vadd.s32 4294967256, %v254_v48  ;;  %s810_s17 = scalar_lea.vmem %s1208_s4, 2048  ;;  %p1267_p12 = scmp.ne.s32.totalorder %s1263_s24, 0 }
  0x3d   : > { %215 = vadd.xlane.f32.xlu1 %v214_v11  ;;  %674 = vmatprep.subr.mxu0 %v879_v24  ;;  %v237_v32 = vld [vmem:[%s1256_s1] sm:$0xff]  ;;  %v397_v33 = vld [vmem:[%s1257_s2 + $0x78] sm:$0xff]  ;;  %v396_v34 = vld [vmem:[%s1257_s2 + $0x70] sm:$0xff]  ;;  %p811_p11 = scmp.ne.s32.totalorder %s1208_s4, %s810_s17  ;;  %s881_s19 = smov [#allocation5]  }
  0x3e   : > { %675 = vmatpush3.msra.mxu0 %v243_v26  ;;  %692 = vmatpush3.msra.mxu1 %v397_v33  ;;  %v395_v35 = vld [vmem:[%s1257_s2 + $0x68] sm:$0xff]  ;;  %v394_v36 = vld [vmem:[%s1257_s2 + $0x60] sm:$0xff]  ;;  %v393_v37 = vld [vmem:[%s1257_s2 + $0x58] sm:$0xff]  ;;  %s814_s20 = sshll.u32 %s881_s19, 4  ;;  %s815_s20 = int_to_ptr.vmem [resolvable:$false] %s814_s20 }
  0x3f   : > { %676 = vmatprep.subr.mxu0 %v879_v24  ;;  %693 = vmatprep.subr.mxu1 %v879_v24  ;;  %v392_v38 = vld [vmem:[%s1257_s2 + $0x50] sm:$0xff]  ;;  %v391_v39 = vld [vmem:[%s1257_s2 + $0x48] sm:$0xff]  ;;  %v390_v40 = vld [vmem:[%s1257_s2 + $0x40] sm:$0xff]  ;;  %p812_p13 = pnand %p811_p11, %p1267_p12  ;;  %s816_s22 = scalar_lea.vmem %s815_s20, 4096 }
  0x40   : > { %218 = vadd.xlane.f32.xlu0 %v217_v16  ;;  %677 = vmatpush3.msra.mxu0 %v242_v27  ;;  %v389_v41 = vld [vmem:[%s1257_s2 + $0x38] sm:$0xff]  ;;  %v388_v42 = vld [vmem:[%s1257_s2 + $0x30] sm:$0xff]  ;;  %v387_v43 = vld [vmem:[%s1257_s2 + $0x28] sm:$0xff]  ;;  %v290_v27 = vsub.s32 %v287_v63, %v1150_v49  ;;  %p817_p5 = scmp.lt.s32.totalorder %s1208_s4, %s815_s20  ;;  %p818_p7 = scmp.lt.s32.totalorder %s816_s22, %s810_s17 }
  0x41   : > { %221 = vadd.xlane.f32.xlu1 %v220_v17  ;;  %678 = vmatprep.subr.mxu0 %v879_v24  ;;  %v386_v44 = vld [vmem:[%s1257_s2 + $0x20] sm:$0xff]  ;;  %v385_v45 = vld [vmem:[%s1257_s2 + $0x18] sm:$0xff]  ;;  %v384_v46 = vld [vmem:[%s1257_s2 + $0x10] sm:$0xff]  ;;  %v283_v17 = vsub.s32 %v280_v58, %v1150_v49  ;;  %p813_p4 = pneg %p812_p13 }
  0x42   : > { %679 = vmatpush3.msra.mxu0 %v241_v28  ;;  %694 = vmatpush3.msra.mxu1 %v396_v34  ;;  %v301_v28 = vadd.s32 4294967240, %v254_v48  ;;  %v383_v50 = vld [vmem:[%s1257_s2 + $0x8] sm:$0xff]  ;;  %p819_p8 = por %p818_p7, %p817_p5 }
  0x43   : > { %680 = vmatprep.subr.mxu0 %v879_v24  ;;  %695 = vmatprep.subr.mxu1 %v879_v24 }
  0x44   : > { %224 = vadd.xlane.f32.xlu0 %v223_v22  ;;  %681 = vmatpush3.msra.mxu0 %v240_v29  ;;  %v294_v22 = vadd.s32 4294967248, %v254_v48  ;;  %p820_p10 = pnand %p819_p8, %p813_p4 }
  0x45   : > { %227 = vadd.xlane.f32.xlu1 %v226_v23  ;;  %682 = vmatprep.subr.mxu0 %v879_v24 }
  0x46   : > { %683 = vmatpush3.msra.mxu0 %v239_v30  ;;  %696 = vmatpush3.msra.mxu1 %v395_v35 }
  0x47   : > { %684 = vmatprep.subr.mxu0 %v879_v24  ;;  %697 = vmatprep.subr.mxu1 %v879_v24 }
  0x48   : > { %685 = vmatpush3.msra.mxu0 %v238_v31  ;;  %698 = vmatpush3.msra.mxu1 %v394_v36  ;;  %v297_v36 = vsub.s32 %v294_v22, %v1150_v49 }
  0x49   : > { %686 = vmatprep.subr.mxu0 %v879_v24  ;;  %699 = vmatprep.subr.mxu1 %v879_v24 }
  0x4a   : > { %687 = vmatpush3.msra.mxu0 %v237_v32  ;;  %700 = vmatpush3.msra.mxu1 %v393_v37 }
  0x4b   : > { %701 = vmatprep.subr.mxu1 %v879_v24 }
  0x4c   : > { %702 = vmatpush3.msra.mxu1 %v392_v38 }
  0x4d   : > { %703 = vmatprep.subr.mxu1 %v879_v24 }
  0x4e   : > { %704 = vmatpush3.msra.mxu1 %v391_v39  ;;  %v304_v39 = vsub.s32 %v301_v28, %v1150_v49 }
  0x4f   : > { %705 = vmatprep.subr.mxu1 %v879_v24 }
  0x50   : > { %706 = vmatpush3.msra.mxu1 %v390_v40 }
  0x51   : > { %707 = vmatprep.subr.mxu1 %v879_v24 }
  0x52   : > { %708 = vmatpush3.msra.mxu1 %v389_v41 }
  0x53   : > { %709 = vmatprep.subr.mxu1 %v879_v24 }
  0x54   : > { %710 = vmatpush3.msra.mxu1 %v388_v42 }
  0x55   : > { %711 = vmatprep.subr.mxu1 %v879_v24 }
  0x56   : > { %712 = vmatpush3.msra.mxu1 %v387_v43 }
  0x57   : > { %713 = vmatprep.subr.mxu1 %v879_v24 }
  0x58   : > { %714 = vmatpush3.msra.mxu1 %v386_v44 }
  0x59   : > { %715 = vmatprep.subr.mxu1 %v879_v24 }
  0x5a   : > { %716 = vmatpush3.msra.mxu1 %v385_v45 }
  0x5b   : > { %717 = vmatprep.subr.mxu1 %v879_v24 }
  0x5c   : > { %718 = vmatpush3.msra.mxu1 %v384_v46 }
  0x5d   : > { %719 = vmatprep.subr.mxu1 %v879_v24 }
  0x5e   : > { %720 = vmatpush3.msra.mxu1 %v383_v50 }
  0x5f   : > { %721 = vmatprep.subr.mxu1 %v879_v24 }
  0xc1   : > { %v207_v51 = vpop.xlane.xlu0 %206 }
  0xc2   : > { %v213_v54 = vpop.xlane.xlu1 %212  ;;  %v229_v56 = vmul.f32 0.00390625, %v207_v51  ;;  %v382_v51 = vld [vmem:[%s1257_s2] sm:$0xff] }
  0xc3   : > { %v231_v60 = vmul.f32 0.00390625, %v213_v54  ;;  %722 = vmatpush3.msra.mxu1 %v382_v51 }
  0xc4   : > { %v258_v11 = vrot.slane %v229_v56, %v257_v55 }
  0xc5   : > { %v210_v61 = vpop.xlane.xlu0 %209  ;;  %v270_v23 = vrot.slane %v231_v60, %v269_v59  ;;  %v476_v60 = vsub.s32 0, %v1150_v49 }
  0xc6   : > { %v230_v3 = vmul.f32 0.00390625, %v210_v61  ;;  %v216_v7 = vpop.xlane.xlu1 %215 }
  0xc7   : > { %v232_v10 = vmul.f32 0.00390625, %v216_v7 }
  0xc8   : > { %v263_v16 = vrot.slane %v230_v3, %v262_v57 }
  0xc9   : > { %v277_v25 = vrot.slane %v232_v10, %v276_v62  ;;  %v219_v26 = vpop.xlane.xlu0 %218 }
  0xca   : > { %v265_v29 = vsel %vm264_vm1, %v263_v16, %v258_v11  ;;  %v233_v30 = vmul.f32 0.00390625, %v219_v26  ;;  %v222_v31 = vpop.xlane.xlu1 %221 }
  0xcb   : > { %v272_v32 = vsel %vm271_vm2, %v270_v23, %v265_v29  ;;  %v234_v33 = vmul.f32 0.00390625, %v222_v31 }
  0xcc   : > { %v279_v34 = vsel %vm278_vm3, %v277_v25, %v272_v32  ;;  %v284_v35 = vrot.slane %v233_v30, %v283_v17 }
  0xcd   : > { %v291_v37 = vrot.slane %v234_v33, %v290_v27  ;;  %v225_v38 = vpop.xlane.xlu0 %224 }
  0xce   : > { %v286_v40 = vsel %vm285_vm4, %v284_v35, %v279_v34  ;;  %v235_v41 = vmul.f32 0.00390625, %v225_v38  ;;  %v228_v42 = vpop.xlane.xlu1 %227 }
  0xcf   : > { %v236_v43 = vmul.f32 0.00390625, %v228_v42  ;;  %v293_v45 = vsel %vm292_vm5, %v291_v37, %v286_v40 }
  0xd0   : > { %v298_v44 = vrot.slane %v235_v41, %v297_v36 }
  0xd1   : > { %v305_v46 = vrot.slane %v236_v43, %v304_v39 }
  0xd2   : > { %v300_v47 = vsel %vm299_vm6, %v298_v44, %v293_v45 }
  0xd3   : > { %v307_v48 = vsel %vm306_vm7, %v305_v46, %v300_v47 }
  0xd4   : > { %689 = vmatmul.mubr.msk.f32.vlgmr.msra.gmra.mxu0 %vm308_vm8, %v307_v48 }
 0x194   : > { %v377_v52 = vpop.f32.mrf.mxu0 }
 0x195   : > { %v381_v53 = vmax.f32 %v377_v52, 0.0 }
 0x196   : > { %v690_v54 = vpop.f32.mrf.mxu0 }
 0x197   : > { %724 = vmatmul.mubr.f32.vlgmr.msra.gmra.mxu1 %v381_v53 }
 0x257   : > { %v464_v55 = vpop.f32.mrf.mxu1 }
 0x258   : > { %v638_v56 = vmul.f32 -1.442695, %v464_v55 }
 0x259   : > { %v725_v57 = vpop.f32.mrf.mxu1 }
 0x25a   : > { %778 = vpow2.f32 %v638_v56 }
 0x267   : > { %v779_v58 = vpop.eup %778 }
 0x268   : > { %v471_v59 = vadd.f32 1.0, %v779_v58 }
 0x26a   : > { %780 = vrcp.f32 %v471_v59 }
 0x277   : > { %v781_v61 = vpop.eup %780 }
 0x278   : > { %v477_v24 = vrot.slane %v781_v61, %v476_v60 }
 0x27a   : > { %483 = vbcast.lane.b32.xlu1 %v477_v24, 264  ;;  %479 = vbcast.lane.b32.xlu0 %v477_v24, 256 }
 0x27e   : > { %487 = vbcast.lane.b32.xlu1 %v477_v24, 272  ;;  %495 = vbcast.lane.b32.xlu0 %v477_v24, 288 }
 0x282   : > { %491 = vbcast.lane.b32.xlu1 %v477_v24, 280  ;;  %503 = vbcast.lane.b32.xlu0 %v477_v24, 304 }
 0x286   : > { %499 = vbcast.lane.b32.xlu1 %v477_v24, 296 }
 0x28a   : > { %507 = vbcast.lane.b32.xlu1 %v477_v24, 312 }
 0x2ec   : > { %v484_v62 = vpop.permute.xlu1 %483  ;;  %v480_v63 = vpop.permute.xlu0 %479 }
 0x2ed   : > { %v511_v3 = vmul.f32 %v484_v62, %v1021_v5  ;;  %v512_v7 = vmul.f32 %v484_v62, %v1023_v6  ;;  %v509_v10 = vmul.f32 %v480_v63, %v1011_v0  ;;  %v510_v49 = vmul.f32 %v480_v63, %v1013_v1 }
 0x2ef   : > { %527 = vst [vmem:[%s1175_s23 + $0x10] sm:$0xff] %v511_v3  ;;  %528 = vst [vmem:[%s1175_s23 + $0x18] sm:$0xff] %v512_v7 }
 0x2f0   : > { %525 = vst [vmem:[%s1175_s23] sm:$0xff] %v509_v10  ;;  %526 = vst [vmem:[%s1175_s23 + $0x8] sm:$0xff] %v510_v49  ;;  %v488_v5 = vpop.permute.xlu1 %487  ;;  %v496_v0 = vpop.permute.xlu0 %495 }
 0x2f1   : > { %v513_v1 = vmul.f32 %v488_v5, %v1015_v2  ;;  %v514_v6 = vmul.f32 %v488_v5, %v1019_v4  ;;  %v517_v11 = vmul.f32 %v496_v0, %v1035_v12  ;;  %v518_v16 = vmul.f32 %v496_v0, %v1037_v13 }
 0x2f3   : > { %529 = vst [vmem:[%s1175_s23 + $0x20] sm:$0xff] %v513_v1  ;;  %530 = vst [vmem:[%s1175_s23 + $0x28] sm:$0xff] %v514_v6 }
 0x2f4   : > { %533 = vst [vmem:[%s1175_s23 + $0x40] sm:$0xff] %v517_v11  ;;  %534 = vst [vmem:[%s1175_s23 + $0x48] sm:$0xff] %v518_v16  ;;  %v492_v17 = vpop.permute.xlu1 %491  ;;  %v504_v22 = vpop.permute.xlu0 %503 }
 0x2f5   : > { %v515_v2 = vmul.f32 %v492_v17, %v1027_v8  ;;  %v516_v23 = vmul.f32 %v492_v17, %v1029_v9  ;;  %v521_v4 = vmul.f32 %v504_v22, %v1047_v18  ;;  %v522_v12 = vmul.f32 %v504_v22, %v1049_v19 }
 0x2f7   : > { %531 = vst [vmem:[%s1175_s23 + $0x30] sm:$0xff] %v515_v2  ;;  %532 = vst [vmem:[%s1175_s23 + $0x38] sm:$0xff] %v516_v23 }
 0x2f8   : > { %537 = vst [vmem:[%s1175_s23 + $0x60] sm:$0xff] %v521_v4  ;;  %538 = vst [vmem:[%s1175_s23 + $0x68] sm:$0xff] %v522_v12  ;;  %v500_v13 = vpop.permute.xlu1 %499 }
 0x2f9   : > { %v519_v25 = vmul.f32 %v500_v13, %v1039_v14  ;;  %v520_v26 = vmul.f32 %v500_v13, %v1041_v15 }
 0x2fb   : > { %535 = vst [vmem:[%s1175_s23 + $0x50] sm:$0xff] %v519_v25  ;;  %536 = vst [vmem:[%s1175_s23 + $0x58] sm:$0xff] %v520_v26 }
 0x2fc   : > { %v508_v8 = vpop.permute.xlu1 %507 }
 0x2fd   : > { %v523_v9 = vmul.f32 %v508_v8, %v1051_v20  ;;  %v524_v14 = vmul.f32 %v508_v8, %v1053_v21 }
 0x2ff   : > { %539 = vst [vmem:[%s1175_s23 + $0x70] sm:$0xff] %v523_v9  ;;  %540 = vst [vmem:[%s1175_s23 + $0x78] sm:$0xff] %v524_v14 }
 0x300   : > { %823 = shalt.err (!%p820_p10)
}
 0x301   : > { %s824_s26 = scalar_lea.hbm %s1206_s8, 2048  ;;  %s828_s29 = scalar_lea.hbm %s1258_s3, 4096 }
 0x302   : > { %p825_p0 = scmp.ne.s32.totalorder %s1206_s8, %s824_s26  ;;  %p829_p1 = scmp.lt.s32.totalorder %s1206_s8, %s1258_s3 }
 0x303   : > { %p830_p3 = scmp.lt.s32.totalorder %s828_s29, %s824_s26 }
 0x304   : > { %p826_p2 = pnand %p825_p0, %p1267_p12 }
 0x305   : > { %p831_p6 = por %p830_p3, %p829_p1 }
 0x306   : > { %p827_p9 = pneg %p826_p2 }
 0x308   : > { %p832_p11 = pnand %p831_p6, %p827_p9 }
 0x30a   : > { %835 = shalt.err (!%p832_p11)
}
 0x30b   : > { %s882_s11 = smov 256   ;;  %s883_s23 = smov 16  }
 0x30c   : > { %728 = dma.vmem_to_hbm [thread:$0]  (%p1267_p12), %s1208_s4, 2048, %s1206_s8, %s542_s16, %s882_s11, %s882_s11, %s883_s23  }
 0x30d PF: > { %s570_s9 = sand.u32 1, %s862_s12   ;;  %p1268_p13 = scmp.ne.s32.totalorder %s1264_s25, 0 }
 0x30e   : > { %p1269_p4 = scmp.ge.s32.totalorder %s874_s15, 2  ;;  %s571_s6 = scalar_lea.sflag [#allocation4], %s570_s9 }
 0x310   : > { %p735_p5 = pnand %p1269_p4, %p1268_p13 }
 0x312   : > { %p736_p7 = pneg %p735_p5 }
 0x314   : > { %857 = dma.done.wait (%p736_p7), %s571_s6, 2048  }
 0x315   : > { %859 = vsyncadd (%p736_p7), %s571_s6, 4294965248  ;;  %p16_p8 = scmp.ge.s32.totalorder %s929_s18, 4   ;;  %s1270_s12 = smov %s866_s13 }
 0x316   : > { %s1271_s13 = smov %s870_s14  ;;  %s1272_s14 = smov %s941_s21 }
 0x317   : > { %s1273_s15 = smov %s929_s18  ;;  %18 = sbr.rel (!%p16_p8) target bundleno = 5 (0x5), region = 77 }
 0x31c   :  { %576 = vsyncpa [#allocation3], 1 }
 0x31d   :  { %578 = vsyncpa [#allocation3 + $0x1], 1 }
 0x31e   :  { %579 = vsyncpa [#allocation4], 1 }
 0x31f   :  { %581 = vsyncpa [#allocation4 + $0x1], 1 }

</bundles_post_ra>
